<compile_context>
chip_gen: v7x
topology: tpu7x:2x2x1
jax: 0.10.0
libtpu: 0.0.40
codegen_flags: <defaults>
</compile_context>

<pallas_src>
import functools
import numpy as np
import jax
import jax.numpy as jnp
from jax.experimental import pallas as pl
from jax.experimental.pallas import tpu as pltpu

# ----------------------- configuration (small test sizes) -----------------------
NUM_CLASSES = 5
BACKBONE_CHS = [16, 32, 64]       # scaled-down stand-in for [256, 512, 1024]
CM_BIN_SIZES = [1, 2, 4]
CM_OUT_CH = 32                    # scaled-down stand-in for 128
ARM_OUT_CHS = [16, 24, 32]        # scaled-down stand-in for [64, 96, 128]
SEG_HEAD_MID = 16
BN_EPS = 1e-5

ACT_DTYPE = jnp.bfloat16          # intermediate activation dtype (HBM traffic /2)


# ================================ Pallas kernels ================================

def _conv_kernel(x_ref, w_ref, b_ref, o_ref, xp_ref, *, K, pad, act):
    """Stride-1 'same' KxK conv + folded BN + optional ReLU as K banded matmuls.

    x_ref : (1, H, W*Cin) bf16       lane-flattened NHWC block (one image)
    w_ref : (K, W*Cin, W*Cout) bf16  banded block-Toeplitz weights (BN scale folded)
    b_ref : (1, W*Cout) f32          folded BN bias tiled over W
    o_ref : (1, H, W*Cout)
    xp_ref: VMEM (H+2*pad, W*Cin) bf16 scratch (row-zero-padded input)
    """
    H = o_ref.shape[1]
    Hp, L = xp_ref.shape
    # Only the 2*pad halo rows need zeroing; the body is overwritten every step.
    xp_ref[0:pad, :] = jnp.zeros((pad, L), xp_ref.dtype)
    xp_ref[Hp - pad:Hp, :] = jnp.zeros((pad, L), xp_ref.dtype)
    xp_ref[pad:pad + H, :] = x_ref[0]
    acc = jnp.zeros(o_ref.shape[1:], jnp.float32)
    for dy in range(K):
        acc = acc + jnp.dot(xp_ref[dy:dy + H, :], w_ref[dy],
                            preferred_element_type=jnp.float32)
    y = acc + b_ref[...]
    if act == "relu":
        y = jnp.maximum(y, 0.0)
    o_ref[0] = y.astype(o_ref.dtype)


def _conv1x1_kernel(x_ref, w_ref, b_ref, o_ref, *, act):
    """1x1 conv + folded BN + optional ReLU: a single lane-dense matmul."""
    y = jnp.dot(x_ref[0], w_ref[0], preferred_element_type=jnp.float32) + b_ref[...]
    if act == "relu":
        y = jnp.maximum(y, 0.0)
    o_ref[0] = y.astype(o_ref.dtype)


def _resample_kernel(x_ref, ah_ref, b_ref, o_ref):
    """out2d = Ah @ x2d @ kron(Aw^T, I_C): separable pool / bilinear resize.

    x_ref: (1, Hin, Win*C) bf16;  ah_ref: (Hout, Hin) bf16;
    b_ref: (Win*C, Wout*C) bf16;  o_ref: (1, Hout, Wout*C)
    """
    t = jnp.dot(ah_ref[...], x_ref[0], preferred_element_type=jnp.float32)
    y = jnp.dot(t.astype(jnp.bfloat16), b_ref[...],
                preferred_element_type=jnp.float32)
    o_ref[0] = y.astype(o_ref.dtype)


def _chan_stats_kernel(x_ref, y_ref, o_ref):
    """avg_max_reduce_channel([x, y]) -> (1, H, W, 4) = [mean x, max x, mean y, max y]."""
    x = x_ref[0].astype(jnp.float32)
    y = y_ref[0].astype(jnp.float32)
    stats = jnp.concatenate(
        [jnp.mean(x, axis=-1, keepdims=True),
         jnp.max(x, axis=-1, keepdims=True),
         jnp.mean(y, axis=-1, keepdims=True),
         jnp.max(y, axis=-1, keepdims=True)], axis=-1)
    o_ref[0] = stats.astype(o_ref.dtype)


def _fuse_kernel(x_ref, y_ref, a_ref, o_ref):
    """UAFM fuse: out = x * sigmoid(a) + y * (1 - sigmoid(a))."""
    x = x_ref[0].astype(jnp.float32)
    y = y_ref[0].astype(jnp.float32)
    a = jax.nn.sigmoid(a_ref[0].astype(jnp.float32))          # (H, W, 1), EUP
    o_ref[0] = (x * a + y * (1.0 - a)).astype(o_ref.dtype)


# ================================ kernel wrappers ================================

def make_band_matrices(w, W, pad):
    """Banded block-Toeplitz conv weights.

    w: (K, K, Cin, Cout).  Returns M: (K, W*Cin, W*Cout) with
    M[dy, q*Cin+c, j*Cout+co] = w[dy, q-j+pad, c, co] if 0 <= q-j+pad < K else 0,
    so that  out[:, j*Cout+co] = sum_dy  xpad_rows[dy:dy+H, :] @ M[dy].
    The W-direction 'same' padding is absorbed into the band structure.
    """
    K, _, Cin, Cout = w.shape
    q = np.arange(W)[:, None]
    j = np.arange(W)[None, :]
    dx = q - j + pad                                   # (W, W)
    valid = (dx >= 0) & (dx < K)
    dx_c = np.clip(dx, 0, K - 1)
    g = w[:, dx_c]                                     # (K, W, W, Cin, Cout)
    g = g * jnp.asarray(valid, w.dtype)[None, :, :, None, None]
    return jnp.transpose(g, (0, 1, 3, 2, 4)).reshape(K, W * Cin, W * Cout)


def conv_bn_act(x, w, scale, bias, *, K, act, out_dtype=ACT_DTYPE):
    """x: (N,H,W,Cin) NHWC; w: (K,K,Cin,Cout); scale/bias: (Cout,). Stride 1, 'same'."""
    N, H, W, Cin = x.shape
    Cout = w.shape[-1]
    pad = K // 2
    w_eff = w * scale.reshape(1, 1, 1, Cout)           # fold eval-mode BN scale
    M = make_band_matrices(w_eff, W, pad).astype(jnp.bfloat16)
    b_t = jnp.tile(bias.astype(jnp.float32), (W,)).reshape(1, W * Cout)
    x2 = x.reshape(N, H, W * Cin).astype(jnp.bfloat16)

    if K == 1:
        kern = functools.partial(_conv1x1_kernel, act=act)
        scratch = []
    else:
        kern = functools.partial(_conv_kernel, K=K, pad=pad, act=act)
        scratch = [pltpu.VMEM((H + 2 * pad, W * Cin), jnp.bfloat16)]

    out = pl.pallas_call(
        kern,
        grid=(N,),
        in_specs=[
            pl.BlockSpec((1, H, W * Cin), lambda n: (n, 0, 0)),
            pl.BlockSpec((K, W * Cin, W * Cout), lambda n: (0, 0, 0)),
            pl.BlockSpec((1, W * Cout), lambda n: (0, 0)),
        ],
        out_specs=pl.BlockSpec((1, H, W * Cout), lambda n: (n, 0, 0)),
        out_shape=jax.ShapeDtypeStruct((N, H, W * Cout), out_dtype),
        scratch_shapes=scratch,
        compiler_params=pltpu.CompilerParams(dimension_semantics=("parallel",)),
    )(x2, M, b_t)
    return out.reshape(N, H, W, Cout)


def spatial_resample(x, Ah, Aw, *, out_dtype=ACT_DTYPE):
    """x: (N,H,W,C) NHWC.  out[n,h,w,c] = sum_{p,q} Ah[h,p] Aw[w,q] x[n,p,q,c]."""
    Ah = jnp.asarray(Ah, jnp.float32)
    Aw = jnp.asarray(Aw, jnp.float32)
    N, H, W, C = x.shape
    Hout, Wout = Ah.shape[0], Aw.shape[0]
    B = jnp.kron(Aw.T, jnp.eye(C, dtype=jnp.float32))       # (W*C, Wout*C)
    x2 = x.reshape(N, H, W * C).astype(jnp.bfloat16)
    out = pl.pallas_call(
        _resample_kernel,
        grid=(N,),
        in_specs=[
            pl.BlockSpec((1, H, W * C), lambda n: (n, 0, 0)),
            pl.BlockSpec((Hout, H), lambda n: (0, 0)),
            pl.BlockSpec((W * C, Wout * C), lambda n: (0, 0)),
        ],
        out_specs=pl.BlockSpec((1, Hout, Wout * C), lambda n: (n, 0, 0)),
        out_shape=jax.ShapeDtypeStruct((N, Hout, Wout * C), out_dtype),
        compiler_params=pltpu.CompilerParams(dimension_semantics=("parallel",)),
    )(x2, Ah.astype(jnp.bfloat16), B.astype(jnp.bfloat16))
    return out.reshape(N, Hout, Wout, C)


def channel_stats(x, y):
    """(N,H,W,C),(N,H,W,C) -> (N,H,W,4) channel avg/max stats (UAFM_SpAtten)."""
    N, H, W, C = x.shape
    return pl.pallas_call(
        _chan_stats_kernel,
        grid=(N,),
        in_specs=[pl.BlockSpec((1, H, W, C), lambda n: (n, 0, 0, 0)),
                  pl.BlockSpec((1, H, W, C), lambda n: (n, 0, 0, 0))],
        out_specs=pl.BlockSpec((1, H, W, 4), lambda n: (n, 0, 0, 0)),
        out_shape=jax.ShapeDtypeStruct((N, H, W, 4), ACT_DTYPE),
        compiler_params=pltpu.CompilerParams(dimension_semantics=("parallel",)),
    )(x.astype(jnp.bfloat16), y.astype(jnp.bfloat16))


def uafm_fuse(x, y, a):
    """out = x*sigmoid(a) + y*(1-sigmoid(a)); x,y: (N,H,W,C); a: (N,H,W,1) f32."""
    N, H, W, C = x.shape
    return pl.pallas_call(
        _fuse_kernel,
        grid=(N,),
        in_specs=[pl.BlockSpec((1, H, W, C), lambda n: (n, 0, 0, 0)),
                  pl.BlockSpec((1, H, W, C), lambda n: (n, 0, 0, 0)),
                  pl.BlockSpec((1, H, W, 1), lambda n: (n, 0, 0, 0))],
        out_specs=pl.BlockSpec((1, H, W, C), lambda n: (n, 0, 0, 0)),
        out_shape=jax.ShapeDtypeStruct((N, H, W, C), ACT_DTYPE),
        compiler_params=pltpu.CompilerParams(dimension_semantics=("parallel",)),
    )(x.astype(jnp.bfloat16), y.astype(jnp.bfloat16), a)


# ======================= interpolation / pooling matrices =======================

def bilinear_matrix(out_size, in_size):
    """Row-stochastic matrix matching F.interpolate(mode='bilinear', align_corners=False)."""
    A = np.zeros((out_size, in_size), np.float32)
    if in_size == 1:
        A[:, 0] = 1.0
        return A
    scale = in_size / out_size
    for d in range(out_size):
        src = max((d + 0.5) * scale - 0.5, 0.0)
        i0 = min(int(np.floor(src)), in_size - 1)
        i1 = min(i0 + 1, in_size - 1)
        w1 = src - i0
        A[d, i0] += 1.0 - w1
        A[d, i1] += w1
    return A


def adaptive_pool_matrix(out_size, in_size):
    """Matrix matching nn.AdaptiveAvgPool2d along one axis."""
    A = np.zeros((out_size, in_size), np.float32)
    for o in range(out_size):
        s = (o * in_size) // out_size
        e = -(-((o + 1) * in_size) // out_size)
        A[o, s:e] = 1.0 / (e - s)
    return A


# ================================== parameters ==================================

def init_params(key):
    keys = iter(jax.random.split(key, 64))

    def cb(cin, cout, k, bn=True):
        fan_in = cin * k * k
        w = jax.random.normal(next(keys), (k, k, cin, cout), jnp.float32) \
            * float(np.sqrt(2.0 / fan_in))                      # kaiming_normal
        s = (1.0 / np.sqrt(1.0 + BN_EPS)) if bn else 1.0        # folded eval-mode BN
        return dict(w=w, scale=jnp.full((cout,), s, jnp.float32),
                    bias=jnp.zeros((cout,), jnp.float32), k=k)

    params = {}
    # synthetic backbone (external to PPLiteSegBase)
    params["backbone"] = []
    c_prev = 3
    for c in BACKBONE_CHS:
        params["backbone"].append(cb(c_prev, c, 3))
        c_prev = c
    # PPContextModule
    params["cm"] = dict(
        stages=[cb(BACKBONE_CHS[-1], CM_OUT_CH, 1) for _ in CM_BIN_SIZES],
        conv_out=cb(CM_OUT_CH, CM_OUT_CH, 3),
    )
    # UAFM_SpAtten arms
    params["arms"] = []
    for i in range(len(BACKBONE_CHS)):
        high_ch = CM_OUT_CH if i == len(BACKBONE_CHS) - 1 else ARM_OUT_CHS[i + 1]
        params["arms"].append(dict(
            conv_x=cb(BACKBONE_CHS[i], high_ch, 3),
            atten1=cb(4, 2, 3),        # ConvBNReLU(4->2, 3x3)
            atten2=cb(2, 1, 3),        # ConvBN(2->1, 3x3)
            conv_out=cb(high_ch, ARM_OUT_CHS[i], 3),
        ))
    # SegHead[0]
    params["seg_head0"] = dict(
        conv=cb(ARM_OUT_CHS[0], SEG_HEAD_MID, 3),
        conv_out=cb(SEG_HEAD_MID, NUM_CLASSES, 1, bn=False),   # plain 1x1, bias=False
    )
    return params


# ================================= forward pass =================================

def conv_block(x, p, act="relu"):
    return conv_bn_act(x, p["w"], p["scale"], p["bias"], K=p["k"], act=act)


def pp_context_module(x, cm_p):
    N, H, W, _ = x.shape
    out = None
    for bin_size, stage_p in zip(CM_BIN_SIZES, cm_p["stages"]):
        pooled = spatial_resample(x, adaptive_pool_matrix(bin_size, H),
                                  adaptive_pool_matrix(bin_size, W))
        y = conv_block(pooled, stage_p)                               # 1x1 ConvBNReLU
        up = spatial_resample(y, bilinear_matrix(H, bin_size),
                              bilinear_matrix(W, bin_size))
        out = up if out is None else out + up
    return conv_block(out, cm_p["conv_out"])                          # 3x3 ConvBNReLU


def uafm_spatten(low, high, arm_p):
    x = conv_block(low, arm_p["conv_x"])                              # prepare_x
    H, W = x.shape[1], x.shape[2]
    y = spatial_resample(high, bilinear_matrix(H, high.shape[1]),
                         bilinear_matrix(W, high.shape[2]))           # prepare_y
    # spatial attention: channel stats -> ConvBNReLU(4->2) -> ConvBN(2->1) -> sigmoid
    stats = channel_stats(x, y)                                       # (N,H,W,4)
    a = conv_block(stats, arm_p["atten1"], act="relu")                # MXU banded conv
    a = conv_bn_act(a, arm_p["atten2"]["w"], arm_p["atten2"]["scale"],
                    arm_p["atten2"]["bias"], K=arm_p["atten2"]["k"],
                    act="none", out_dtype=jnp.float32)                # (N,H,W,1) f32
    fused = uafm_fuse(x, y, a)                                        # x*s(a)+y*(1-s(a))
    return conv_block(fused, arm_p["conv_out"])                       # ConvBNReLU


def seg_head_forward(x, p):
    x = conv_block(x, p["conv"], act="relu")
    return conv_block(x, p["conv_out"], act="none")


def ppliteseg_forward(x_nchw, params):
    x = jnp.transpose(x_nchw, (0, 2, 3, 1)).astype(ACT_DTYPE)         # NCHW -> NHWC
    H0, W0 = x.shape[1], x.shape[2]

    # synthetic backbone: avg-pool /2 + 3x3 ConvBNReLU per stage
    feats = []
    f = x
    for p in params["backbone"]:
        h, w = f.shape[1], f.shape[2]
        f = spatial_resample(f, adaptive_pool_matrix(h // 2, h),
                             adaptive_pool_matrix(w // 2, w))
        f = conv_block(f, p)
        feats.append(f)

    # PPLiteSegHead
    high = pp_context_module(feats[-1], params["cm"])
    out_feats = []
    for i in reversed(range(len(feats))):
        high = uafm_spatten(feats[i], high, params["arms"][i])
        out_feats.insert(0, high)

    # eval path: first seg head + bilinear upsample to input size
    logits = seg_head_forward(out_feats[0], params["seg_head0"])
    logits = spatial_resample(logits, bilinear_matrix(H0, logits.shape[1]),
                              bilinear_matrix(W0, logits.shape[2]),
                              out_dtype=jnp.float32)
    return jnp.transpose(logits, (0, 3, 1, 2))                        # NHWC -> NCHW


# ===================================== main =====================================

if __name__ == "__main__":
    key = jax.random.PRNGKey(0)
    pkey, xkey = jax.random.split(key)
    params = init_params(pkey)
    x = jax.random.normal(xkey, (2, 3, 32, 32), jnp.float32)          # NCHW input
    out = ppliteseg_forward(x, params)
    out = jax.block_until_ready(out)
    assert out.shape == (2, NUM_CLASSES, 32, 32), out.shape
    assert bool(jnp.all(jnp.isfinite(out)))
    print("KERNEL_OK")
</pallas_src>

<mosaic_0001>
module attributes {stable_mosaic.version = 11 : i64} {
  func.func @_resample_kernel(%arg0: i32, %arg1: memref<1x32x96xbf16, #tpu.memory_space<vmem>>, %arg2: memref<16x32xbf16, #tpu.memory_space<vmem>>, %arg3: memref<96x48xbf16, #tpu.memory_space<vmem>>, %arg4: memref<1x16x48xbf16, #tpu.memory_space<vmem>>) attributes {dimension_semantics = [#tpu.dimension_semantics<parallel>], iteration_bounds = array<i64: 2>, scalar_prefetch = 0 : i64, scratch_operands = 0 : i64, tpu.core_type = #tpu.core_type<tc>, window_params = [{transform_indices = @transform_0, window_bounds = array<i64: 1, 32, 96>}, {pipeline_mode = #tpu.pipeline_mode<synchronous>, transform_indices = @transform_1, window_bounds = array<i64: 16, 32>}, {pipeline_mode = #tpu.pipeline_mode<synchronous>, transform_indices = @transform_2, window_bounds = array<i64: 96, 48>}, {transform_indices = @transform_3, window_bounds = array<i64: 1, 16, 48>}]} {
    %c0 = arith.constant 0 : index
    %c0_0 = arith.constant 0 : index
    %0 = vector.load %arg2[%c0, %c0_0] : memref<16x32xbf16, #tpu.memory_space<vmem>>, vector<16x32xbf16>
    %c0_1 = arith.constant 0 : index
    %c0_2 = arith.constant 0 : index
    %c0_3 = arith.constant 0 : index
    %1 = vector.load %arg1[%c0_1, %c0_2, %c0_3] : memref<1x32x96xbf16, #tpu.memory_space<vmem>>, vector<1x32x96xbf16>
    %2 = vector.shape_cast %1 : vector<1x32x96xbf16> to vector<32x96xbf16>
    %cst = arith.constant dense<0.000000e+00> : vector<16x96xf32>
    %3 = tpu.matmul %0, %2, %cst {dimension_numbers = #tpu.dot_dimension_numbers<[1], [0], [0], [1], [0, 0, 1, 1], [], []>} : vector<16x32xbf16>, vector<32x96xbf16>, vector<16x96xf32> -> vector<16x96xf32>
    %4 = arith.truncf %3 : vector<16x96xf32> to vector<16x96xbf16>
    %c0_4 = arith.constant 0 : index
    %c0_5 = arith.constant 0 : index
    %5 = vector.load %arg3[%c0_4, %c0_5] : memref<96x48xbf16, #tpu.memory_space<vmem>>, vector<96x48xbf16>
    %cst_6 = arith.constant dense<0.000000e+00> : vector<16x48xf32>
    %6 = tpu.matmul %4, %5, %cst_6 {dimension_numbers = #tpu.dot_dimension_numbers<[1], [0], [0], [1], [0, 0, 1, 1], [], []>} : vector<16x96xbf16>, vector<96x48xbf16>, vector<16x48xf32> -> vector<16x48xf32>
    %7 = arith.truncf %6 : vector<16x48xf32> to vector<16x48xbf16>
    %c0_7 = arith.constant 0 : index
    %c0_8 = arith.constant 0 : index
    %c0_9 = arith.constant 0 : index
    %8 = vector.load %arg4[%c0_7, %c0_8, %c0_9] : memref<1x16x48xbf16, #tpu.memory_space<vmem>>, vector<1x16x48xbf16>
    %9 = vector.shape_cast %8 : vector<1x16x48xbf16> to vector<16x48xbf16>
    %10 = vector.shape_cast %7 : vector<16x48xbf16> to vector<1x16x48xbf16>
    tpu.vector_store %arg4[%c0_7, %c0_8, %c0_9], %10 {strides = array<i32>} : memref<1x16x48xbf16, #tpu.memory_space<vmem>>, vector<1x16x48xbf16>,
    return
  }
  func.func @transform_0(%arg0: i32) -> (i32, i32, i32) {
    %c0_i32 = arith.constant 0 : i32
    %c0_i32_0 = arith.constant 0 : i32
    %c0_i32_1 = arith.constant 0 : i32
    return %arg0, %c0_i32, %c0_i32_0 : i32, i32, i32
  }
  func.func @transform_1(%arg0: i32) -> (i32, i32) {
    %c0_i32 = arith.constant 0 : i32
    %c0_i32_0 = arith.constant 0 : i32
    %c0_i32_1 = arith.constant 0 : i32
    return %c0_i32, %c0_i32_0 : i32, i32
  }
  func.func @transform_2(%arg0: i32) -> (i32, i32) {
    %c0_i32 = arith.constant 0 : i32
    %c0_i32_0 = arith.constant 0 : i32
    %c0_i32_1 = arith.constant 0 : i32
    return %c0_i32, %c0_i32_0 : i32, i32
  }
  func.func @transform_3(%arg0: i32) -> (i32, i32, i32) {
    %c0_i32 = arith.constant 0 : i32
    %c0_i32_0 = arith.constant 0 : i32
    %c0_i32_1 = arith.constant 0 : i32
    return %arg0, %c0_i32, %c0_i32_0 : i32, i32, i32
  }
}

</mosaic_0001>

<bundles_post_ra>
// kernel: tpu_custom_call.1
= control target key start
LH: loop header
LB: loop body
LE: loop exit
PB: predicated region body
PF: predicated region fallthrough
CT: control target
= control target key end

     0   :  { %8 = vsyncpa [#allocation3], 0  ;;  %s747_s0 = inlined_call_operand.vmem [shape: bf16[2,32,96], index: 0, kind: input, shape index: {}]   ;;  %s748_s1 = inlined_call_operand.vmem [shape: bf16[16,32], index: 1, kind: input, shape index: {}]   ;;  %s749_s2 = inlined_call_operand.vmem [shape: bf16[96,48], index: 2, kind: input, shape index: {}]   ;;  %s750_s3 = inlined_call_operand.hbm [shape: bf16[2,16,48], index: 3, kind: output, shape index: {}]  }
   0x1   :  { %10 = vsyncpa [#allocation3 + $0x1], 0  ;;  %s623_s12 = smov 0   ;;  %s625_s13 = smov 0  }
   0x2   :  { %s627_s14 = smov 0   ;;  %s629_s15 = smov 0  }
   0x3 LB: > { %s644_s16 = sadd.s32 4294967295, %s596_s15   ;;  %s419_s17 = sadd.s32 4294967294, %s596_s15   ;;  %s596_s15 = sphi %s629_s15, %s756_s15   ;;  %s592_s14 = sphi %s627_s14, %s755_s14   ;;  %s588_s13 = sphi %s625_s13, %s754_s13   ;;  %s584_s12 = sphi %s623_s12, %s753_s12  }
   0x4   : > { %s648_s18 = sadd.s32 1, %s596_s15   ;;  %s91_s19 = sadd.s32 1, %s592_s14 }
   0x5   : > { %s88_s20 = ssub.s32 %s596_s15, %s648_s18  ;;  %p101_p0 = scmp.ne.s32.totalorder %s592_s14, %s588_s13 }
   0x6   : > { %p89_p1 = scmp.eq.s32.totalorder %s88_s20, 0  ;;  %p102_p2 = scmp.eq.s32.totalorder %s644_s16, 1 }
   0x7   : > { %p107_p3 = scmp.ne.s32.totalorder %s588_s13, %s584_s12  ;;  %p108_p4 = scmp.eq.s32.totalorder %s419_s17, 1 }
   0x8   : > { %s659_s21 = scalar_select %p89_p1, %s592_s14, %s91_s19  }
   0x9   : > { %p661_p5 = por %p102_p2, %p101_p0  ;;  %p665_p6 = por %p108_p4, %p107_p3 }
   0xa   : > { %p422_p7 = scmp.ge.s32.totalorder %s596_s15, 1  ;;  %p140_p8 = scmp.lt.s32.totalorder %s596_s15, 3 }
   0xc   : > { %p141_p9 = pnand %p422_p7, %p140_p8 }
   0xd   : > { %p164_p10 = scmp.lt.s32.totalorder (!%p141_p9), %s644_s16, 1  ;;  %v598_v0 = vmov (!%p141_p9), 0.0   ;;  %vm599_vm0 = vmmov (!%p141_p9), 0   ;;  %v528_v1 = vld [vmem:[%s749_s2] sm:$0xff] (!%p141_p9)   ;;  %v529_v2 = vld [vmem:[%s749_s2 + $0x8] sm:$0xff] (!%p141_p9)   ;;  %v530_v4 = vld [vmem:[%s749_s2 + $0x10] sm:$0xff] (!%p141_p9)  }
   0xe   : > { %144 = sbr.rel (%p141_p9) target bundleno = 480 (0x1e0), region = 32  ;;  %458 = vmatprep.subr.bf16.mxu0 (!%p141_p9), %v598_v0  ;;  %462 = vmatprep.mubr.msk.bf16.mxu0 (!%p141_p9), %vm599_vm0, %v598_v0  ;;  %v527_v6 = vld [vmem:[%s748_s1] sm:$0xff] (!%p141_p9)   ;;  %v531_v7 = vld [vmem:[%s749_s2 + $0x18] sm:$0xff] (!%p141_p9)   ;;  %vm193_vm1 = vcmask (!%p141_p9), 261120   ;;  %v533_v9 = vld [vmem:[%s749_s2 + $0x28] sm:$0xff] (!%p141_p9)   ;;  %vm287_vm2 = vcmask (!%p141_p9), 785408  }
   0xf   : > { %466 = vmatprep.subr.bf16.mxu1 (!%p141_p9), %v598_v0  ;;  %478 = vmatprep.mubr.msk.bf16.mxu1 (!%p141_p9), %vm599_vm0, %v598_v0  ;;  %v532_v8 = vld [vmem:[%s749_s2 + $0x20] sm:$0xff] (!%p141_p9)   ;;  %s161_s25 = sand.u32 (!%p141_p9), 1, %s588_s13   ;;  %vm340_vm3 = vcmask (!%p141_p9), 388096   ;;  %s600_s7 = smov (!%p141_p9), [#allocation2]  }
  0x10   : > { %467 = vmatpush3.bf16.msra.mxu1 (!%p141_p9), %v528_v1  ;;  %s538_s8 = sshll.u32 (!%p141_p9), %s600_s7, 4  ;;  %s539_s8 = int_to_ptr.vmem [resolvable:$false] %s538_s8 }
  0x11   : > { %468 = vmatprep.subr.bf16.mxu1 (!%p141_p9), %v598_v0  ;;  %s540_s9 = scalar_lea.vmem (!%p141_p9), %s539_s8, 256 }
  0x14   : > { %469 = vmatpush3.bf16.msra.mxu1 (!%p141_p9), %v529_v2 }
  0x15   : > { %s165_s26 = scalar_select %p164_p10, %s644_s16, 1  ;;  %470 = vmatprep.subr.bf16.mxu1 %v598_v0 }
  0x17   : > { %s444_s29 = sshll.u32 %s165_s26, 4  ;;  %s423_s26 = sshll.u32 %s161_s25, 3 }
  0x18   : > { %s168_s5 = scalar_lea.vmem %s747_s0, %s444_s29  ;;  %471 = vmatpush3.bf16.msra.mxu1 %v530_v4  ;;  %s163_s27 = scalar_lea.vmem [#allocation2], %s423_s26 }
  0x19   : > { %v525_v3 = vld [vmem:[%s168_s5] sm:$0xff]   ;;  %v526_v5 = vld [vmem:[%s168_s5 + $0x8] sm:$0xff]   ;;  %472 = vmatprep.subr.bf16.mxu1 %v598_v0  ;;  %s357_s28 = sshll.u32 %s163_s27, 4  ;;  %s447_s29 = sshll.u32 %s644_s16, 7  ;;  %s699_s28 = int_to_ptr.vmem [resolvable:$true] %s357_s28 }
  0x1a   : > { %459 = vmatpush3.bf16.msra.mxu0 %v525_v3  ;;  %s704_s5 = scalar_lea.hbm %s750_s3, %s447_s29  ;;  %s706_s16 = scalar_lea.sflag [#allocation3], %s161_s25 }
  0x1b   : > { %460 = vmatprep.subr.bf16.mxu0 %v598_v0  ;;  %s534_s6 = scalar_lea.vmem %s699_s28, 128  ;;  %p541_p0 = scmp.lt.s32.totalorder %s699_s28, %s539_s8 }
  0x1c   : > { %473 = vmatpush3.bf16.msra.mxu1 %v531_v7  ;;  %p535_p11 = scmp.ne.s32.totalorder %s699_s28, %s534_s6  ;;  %p542_p1 = scmp.lt.s32.totalorder %s540_s9, %s534_s6 }
  0x1d   : > { %474 = vmatprep.subr.bf16.mxu1 %v598_v0 }
  0x1e   : > { %461 = vmatpush3.bf16.msra.mxu0 %v526_v5  ;;  %p536_p12 = pnand %p535_p11, %p661_p5  ;;  %p543_p2 = por %p542_p1, %p541_p0 }
  0x20   : > { %475 = vmatpush3.bf16.msra.mxu1 %v532_v8  ;;  %p537_p13 = pneg %p536_p12 }
  0x21   : > { %463 = vmatmul.mubr.msk.bf16.vlgmr.msra.gmra.mrb[0].mxu0 %vm193_vm1, %v527_v6  ;;  %476 = vmatprep.subr.bf16.mxu1 %v598_v0 }
  0x22   : > { %p544_p3 = pnand %p543_p2, %p537_p13 }
  0x24   : > { %477 = vmatpush3.bf16.msra.mxu1 %v533_v9 }
  0xf4   : > { %v231_v10 = vpop.f32.mrb[0].mxu0 }
  0xf5   : > { %v464_v11 = vpop.f32.mrb[1].mxu0 }
  0xf6   : > { %v234_v12 = vpop.f32.mrb[2].mxu0 }
  0xf7   : > { %v238_v13 = vpack.c.bf16 %v234_v12, %v231_v10  ;;  %v465_v14 = vpop.f32.mrb[3].mxu0 }
  0xf9   : > { %479 = vmatmul.mubr.msk.bf16.vlgmr.msra.gmra.mrb[0].mxu1 %vm287_vm2, %v238_v13 }
 0x1cc   : > { %v325_v15 = vpop.f32.mrb[0].mxu1 }
 0x1cd   : > { %v445_v16 = vpack.c.bf16 %v325_v15, %v325_v15  ;;  %v480_v17 = vpop.f32.mrb[1].mxu1 }
 0x1ce   : > { %v328_v18 = vpop.f32.mrb[2].mxu1 }
 0x1cf   : > { %341 = vst.msk [vmem:[%s163_s27] sm:$0xf] %vm340_vm3, %v445_v16  ;;  %v446_v19 = vpack.c.bf16 %v328_v18, %v328_v18  ;;  %v481_v20 = vpop.f32.mrb[3].mxu1 }
 0x1d1   : > { %342 = vst.msk [vmem:[%s163_s27 + $0x4] sm:$0xf] %vm340_vm3, %v446_v19 }
 0x1d2   : > { %547 = shalt.err (!%p544_p3)
}
 0x1d3   : > { %s548_s10 = scalar_lea.hbm %s704_s5, 128  ;;  %s552_s19 = scalar_lea.hbm %s750_s3, 256 }
 0x1d4   : > { %p549_p4 = scmp.ne.s32.totalorder %s704_s5, %s548_s10  ;;  %p553_p9 = scmp.lt.u32.totalorder %s704_s5, %s750_s3 }
 0x1d5   : > { %p554_p10 = scmp.lt.u32.totalorder %s552_s19, %s548_s10  ;;  %p556_p12 = scmp.lt.u32.totalorder %s548_s10, %s704_s5 }
 0x1d6   : > { %p550_p7 = pnand %p549_p4, %p661_p5 }
 0x1d7   : > { %p555_p11 = por %p554_p10, %p553_p9 }
 0x1d8   : > { %p551_p8 = pneg %p550_p7 }
 0x1d9   : > { %p557_p13 = por %p556_p12, %p555_p11 }
 0x1db   : > { %p558_p0 = pnand %p557_p13, %p551_p8 }
 0x1dd   : > { %561 = shalt.err (!%p558_p0)
}
 0x1de   : > { %s601_s25 = smov 64   ;;  %s602_s26 = smov 4  }
 0x1df   : > { %482 = dma.vmem_to_hbm [thread:$0]  (%p661_p5), %s699_s28, 128, %s704_s5, %s706_s16, %s601_s25, %s601_s25, %s602_s26  }
 0x1e0 PF: > { %p488_p1 = scmp.ge.s32.totalorder %s596_s15, 2  ;;  %s372_s27 = sand.u32 1, %s584_s12  }
 0x1e1   : > { %s373_s29 = scalar_lea.sflag [#allocation3], %s372_s27 }
 0x1e2   : > { %p485_p2 = pnand %p488_p1, %p665_p6 }
 0x1e4   : > { %579 = dma.done.wait (!%p485_p2), %s373_s29, 128  }
 0x1e5   : > { %581 = vsyncadd (!%p485_p2), %s373_s29, 4294967168  ;;  %p13_p3 = scmp.ge.s32.totalorder %s648_s18, 4   ;;  %s753_s12 = smov %s588_s13 }
 0x1e6   : > { %s754_s13 = smov %s592_s14  ;;  %s755_s14 = smov %s659_s21 }
 0x1e7   : > { %s756_s15 = smov %s648_s18  ;;  %15 = sbr.rel (!%p13_p3) target bundleno = 3 (0x3), region = 67 }
 0x1ee   :  { %378 = vsyncpa [#allocation3], 1 }
 0x1ef   :  { %380 = vsyncpa [#allocation3 + $0x1], 1 }

</bundles_post_ra>
